<compile_context>
chip_gen: v7x
topology: tpu7x:2x2x1
jax: 0.10.0
libtpu: 0.0.40
codegen_flags: <defaults>
</compile_context>

<pallas_src>
import math

import numpy as np

import jax
import jax.numpy as jnp
from jax.experimental import pallas as pl
from jax.experimental.pallas import tpu as pltpu


def diffusion_train_kernel(coef_a_ref, coef_b_ref,            # SMEM: (B,) scalars
                           x0_ref, noise_ref, bias_ref,       # VMEM tiles
                           w1_ref, w2_ref, b2_ref,            # VMEM weights (const maps)
                           loss_ref):                         # VMEM out tile
    b = pl.program_id(0)                  # batch element of this tile

    a = coef_a_ref[b]                     # sqrt_alphas_bar[t_b]
    s = coef_b_ref[b]                     # sqrt_one_minus_alphas_bar[t_b]

    x0 = x0_ref[0]                        # (C, TN)
    noise = noise_ref[0]                  # (C, TN)

    # q-sample: x_t = sqrt(a_bar_t) * x_0 + sqrt(1 - a_bar_t) * eps
    x_t = a * x0 + s * noise

    # synthetic noise-prediction model (1x1-conv MLP, time-conditioned)
    h = jnp.dot(w1_ref[...], x_t, preferred_element_type=jnp.float32)   # (hidden, TN)
    h = h + bias_ref[0]                   # b1 + temb(t_b), (hidden, 1)
    h = h * jax.nn.sigmoid(h)             # SiLU
    out = jnp.dot(w2_ref[...], h, preferred_element_type=jnp.float32)   # (C, TN)
    out = out + b2_ref[...]

    # F.mse_loss(output_model, noise, reduction='none')  (noise_order == 1)
    diff = out - noise
    loss_ref[0] = (diff * diff).astype(loss_ref.dtype)


def make_linear_schedule(beta_1, beta_T, T):
    # Mirror the PyTorch float64 buffers, then cast for the f32 kernel.
    betas = np.linspace(beta_1, beta_T, T, dtype=np.float64)
    alphas = 1.0 - betas
    alphas_bar = np.cumprod(alphas)
    return {
        "sqrt_alphas_bar": jnp.asarray(np.sqrt(alphas_bar), jnp.float32),
        "sqrt_one_minus_alphas_bar": jnp.asarray(np.sqrt(1.0 - alphas_bar), jnp.float32),
        "one_minus_alphas_bar": jnp.asarray(1.0 - alphas_bar, jnp.float32),
    }


def init_model_params(key, channels, hidden):
    k1, k2, k3 = jax.random.split(key, 3)
    w1 = jax.random.normal(k1, (hidden, channels), jnp.float32) * 0.1
    b1 = jnp.zeros((hidden, 1), jnp.float32)
    w2 = jax.random.normal(k2, (channels, hidden), jnp.float32) * 0.1
    b2 = jnp.zeros((channels, 1), jnp.float32)
    w_t = jax.random.normal(k3, (hidden, hidden), jnp.float32) * 0.1  # time-emb projection
    return {"w1": w1, "b1": b1, "w2": w2, "b2": b2, "w_t": w_t}


def _choose_tile(hw, channels, hidden, vmem_tile_budget_bytes=12 * 1024 * 1024):
    """Largest lane tile (multiple of 128) dividing HW that fits the VMEM budget."""
    # TODO(synk): H*W that is not a multiple of 128 (e.g. 28x28) needs lane padding.
    assert hw % 128 == 0, "H*W must be a multiple of 128 for this kernel"
    # per-lane bytes: double-buffered x0/noise/loss streams + (hidden, TN) intermediates.
    bytes_per_lane = (3 * channels * 2 + 2 * hidden) * 4
    tn_cap = max(128, (vmem_tile_budget_bytes // bytes_per_lane) // 128 * 128)
    tn = 128
    for cand in range(128, hw + 1, 128):
        if hw % cand == 0 and cand <= tn_cap:
            tn = cand
    return tn


def _vmem_limit_bytes(channels, hidden, batch, tn):
    tile_stream = 3 * channels * tn * 4 * 2              # x0, noise, loss, double-buffered
    intermediates = hidden * tn * 4 * 4                   # h/out tiles + headroom
    resident = (2 * hidden * channels + channels + batch * hidden) * 4
    need = 2 * (tile_stream + intermediates + resident)
    return int(min(48 * 1024 * 1024, max(4 * 1024 * 1024, need)))   # v7x-safe cap


def gaussian_diffusion_trainer_forward(x_0, key, params, schedule, T,
                                       rescale_time=True, time_shift=False):
    """Mirrors GaussianDiffusionTrainer.forward (noise_order == 1 branch)."""
    B, C, H, W = x_0.shape
    HW = H * W
    hidden = params["w1"].shape[0]
    TN = _choose_tile(HW, C, hidden)

    kt, kn = jax.random.split(key)
    # t = torch.randint(T, size=(B,))
    t = jax.random.randint(kt, (B,), 0, T)
    # noise = torch.randn_like(x_0)  (host/framework RNG, streamed into the kernel)
    noise = jax.random.normal(kn, (B, C, HW), jnp.float32)

    # extract(...) -> per-batch scalars (read from SMEM inside the kernel)
    coef_a = schedule["sqrt_alphas_bar"][t].astype(jnp.float32)             # (B,)
    coef_b = schedule["sqrt_one_minus_alphas_bar"][t].astype(jnp.float32)   # (B,)

    # time conditioning (model glue): scaled timestep -> sinusoidal emb -> linear,
    # pre-folded into the first-layer bias (one small (B, hidden, 1) stream).
    rescale_ratio = (1000.0 / float(T)) if rescale_time else 1.0
    t_model = (t + (1 if time_shift else 0)).astype(jnp.float32) * rescale_ratio
    half = hidden // 2
    freqs = jnp.exp(-math.log(10000.0) * jnp.arange(half, dtype=jnp.float32) / half)
    ang = t_model[:, None] * freqs[None, :]
    sincos = jnp.concatenate([jnp.sin(ang), jnp.cos(ang)], axis=-1)         # (B, hidden)
    temb = sincos @ params["w_t"]                                           # (B, hidden)
    bias1 = params["b1"][None, :, :] + temb[:, :, None]                     # (B, hidden, 1)

    # (B, C, HW) view — a free reshape, no host-side transposes.
    x0_flat = x_0.reshape(B, C, HW).astype(jnp.float32)

    smem_spec = pl.BlockSpec(memory_space=pltpu.MemorySpace.SMEM)

    loss_flat = pl.pallas_call(
        diffusion_train_kernel,
        out_shape=jax.ShapeDtypeStruct((B, C, HW), jnp.float32),
        grid=(B, HW // TN),
        in_specs=[
            smem_spec,                                               # coef_a (B,)
            smem_spec,                                               # coef_b (B,)
            pl.BlockSpec((1, C, TN), lambda b, j: (b, 0, j)),        # x_0 tile
            pl.BlockSpec((1, C, TN), lambda b, j: (b, 0, j)),        # noise tile
            pl.BlockSpec((1, hidden, 1), lambda b, j: (b, 0, 0)),    # b1 + temb[t_b]
            pl.BlockSpec((hidden, C), lambda b, j: (0, 0)),          # w1 (DMA'd once)
            pl.BlockSpec((C, hidden), lambda b, j: (0, 0)),          # w2 (DMA'd once)
            pl.BlockSpec((C, 1), lambda b, j: (0, 0)),               # b2 (DMA'd once)
        ],
        out_specs=pl.BlockSpec((1, C, TN), lambda b, j: (b, 0, j)),
        compiler_params=pltpu.CompilerParams(
            dimension_semantics=("parallel", "parallel"),
            vmem_limit_bytes=_vmem_limit_bytes(C, hidden, B, TN)),
    )(coef_a, coef_b, x0_flat, noise, bias1,
      params["w1"], params["w2"], params["b2"])

    return loss_flat.reshape(B, C, H, W)


if __name__ == "__main__":
    B, C, H, W = 2, 4, 16, 16
    HIDDEN = 32
    T = 100
    BETA_1, BETA_T = 1e-4, 0.02

    root = jax.random.PRNGKey(0)
    k_x, k_params, k_fwd = jax.random.split(root, 3)

    x_0 = jax.random.normal(k_x, (B, C, H, W), jnp.float32)
    params = init_model_params(k_params, C, HIDDEN)
    schedule = make_linear_schedule(BETA_1, BETA_T, T)

    loss = gaussian_diffusion_trainer_forward(
        x_0, k_fwd, params, schedule, T, rescale_time=True, time_shift=False)
    loss = jax.block_until_ready(loss)

    assert loss.shape == (B, C, H, W)
    assert loss.dtype == jnp.float32
    assert bool(jnp.all(loss >= 0.0))
    assert bool(jnp.all(jnp.isfinite(loss)))
    # TODO(synk): noise_order > 1 / nll_training (error_three) loss branches not exercised.
    print("KERNEL_OK")
</pallas_src>

<mosaic_0001>
module attributes {stable_mosaic.version = 11 : i64} {
  func.func @diffusion_train_kernel(%arg0: i32, %arg1: i32, %arg2: memref<2xf32, #tpu.memory_space<smem>>, %arg3: memref<2xf32, #tpu.memory_space<smem>>, %arg4: memref<1x4x256xf32, #tpu.memory_space<vmem>>, %arg5: memref<1x4x256xf32, #tpu.memory_space<vmem>>, %arg6: memref<1x32x1xf32, #tpu.memory_space<vmem>>, %arg7: memref<32x4xf32, #tpu.memory_space<vmem>>, %arg8: memref<4x32xf32, #tpu.memory_space<vmem>>, %arg9: memref<4x1xf32, #tpu.memory_space<vmem>>, %arg10: memref<1x4x256xf32, #tpu.memory_space<vmem>>) attributes {dimension_semantics = [#tpu.dimension_semantics<parallel>, #tpu.dimension_semantics<parallel>], iteration_bounds = array<i64: 2, 1>, scalar_prefetch = 0 : i64, scratch_operands = 0 : i64, tpu.core_type = #tpu.core_type<tc>, window_params = [{transform_indices = @transform_0, window_bounds = array<i64: 2>}, {transform_indices = @transform_1, window_bounds = array<i64: 2>}, {transform_indices = @transform_2, window_bounds = array<i64: 1, 4, 256>}, {transform_indices = @transform_3, window_bounds = array<i64: 1, 4, 256>}, {transform_indices = @transform_4, window_bounds = array<i64: 1, 32, 1>}, {pipeline_mode = #tpu.pipeline_mode<synchronous>, transform_indices = @transform_5, window_bounds = array<i64: 32, 4>}, {pipeline_mode = #tpu.pipeline_mode<synchronous>, transform_indices = @transform_6, window_bounds = array<i64: 4, 32>}, {pipeline_mode = #tpu.pipeline_mode<synchronous>, transform_indices = @transform_7, window_bounds = array<i64: 4, 1>}, {transform_indices = @transform_8, window_bounds = array<i64: 1, 4, 256>}]} {
    %0 = arith.index_cast %arg0 : i32 to index
    %1 = memref.load %arg2[%0] : memref<2xf32, #tpu.memory_space<smem>>
    %2 = arith.index_cast %arg0 : i32 to index
    %3 = memref.load %arg3[%2] : memref<2xf32, #tpu.memory_space<smem>>
    %c0 = arith.constant 0 : index
    %c0_0 = arith.constant 0 : index
    %c0_1 = arith.constant 0 : index
    %4 = vector.load %arg4[%c0, %c0_0, %c0_1] : memref<1x4x256xf32, #tpu.memory_space<vmem>>, vector<1x4x256xf32>
    %5 = vector.shape_cast %4 : vector<1x4x256xf32> to vector<4x256xf32>
    %c0_2 = arith.constant 0 : index
    %c0_3 = arith.constant 0 : index
    %c0_4 = arith.constant 0 : index
    %6 = vector.load %arg5[%c0_2, %c0_3, %c0_4] : memref<1x4x256xf32, #tpu.memory_space<vmem>>, vector<1x4x256xf32>
    %7 = vector.shape_cast %6 : vector<1x4x256xf32> to vector<4x256xf32>
    %8 = vector.broadcast %1 : f32 to vector<4x256xf32>
    %9 = arith.mulf %8, %5 : vector<4x256xf32>
    %10 = vector.broadcast %3 : f32 to vector<4x256xf32>
    %11 = arith.mulf %10, %7 : vector<4x256xf32>
    %12 = arith.addf %9, %11 : vector<4x256xf32>
    %c0_5 = arith.constant 0 : index
    %c0_6 = arith.constant 0 : index
    %13 = vector.load %arg7[%c0_5, %c0_6] : memref<32x4xf32, #tpu.memory_space<vmem>>, vector<32x4xf32>
    %cst = arith.constant dense<0.000000e+00> : vector<32x256xf32>
    %14 = tpu.matmul %13, %12, %cst {dimension_numbers = #tpu.dot_dimension_numbers<[1], [0], [0], [1], [0, 0, 1, 1], [], []>} : vector<32x4xf32>, vector<4x256xf32>, vector<32x256xf32> -> vector<32x256xf32>
    %c0_7 = arith.constant 0 : index
    %c0_8 = arith.constant 0 : index
    %c0_9 = arith.constant 0 : index
    %15 = vector.load %arg6[%c0_7, %c0_8, %c0_9] : memref<1x32x1xf32, #tpu.memory_space<vmem>>, vector<1x32x1xf32>
    %16 = vector.shape_cast %15 : vector<1x32x1xf32> to vector<32x1xf32>
    %17 = vector.broadcast %16 : vector<32x1xf32> to vector<32x256xf32>
    %18 = arith.addf %14, %17 : vector<32x256xf32>
    %19 = arith.negf %18 : vector<32x256xf32>
    %20 = math.exp %19 : vector<32x256xf32>
    %cst_10 = arith.constant 1.000000e+00 : f32
    %21 = vector.broadcast %cst_10 : f32 to vector<32x256xf32>
    %22 = arith.addf %21, %20 : vector<32x256xf32>
    %23 = arith.divf %21, %22 : vector<32x256xf32>
    %24 = arith.mulf %18, %23 : vector<32x256xf32>
    %c0_11 = arith.constant 0 : index
    %c0_12 = arith.constant 0 : index
    %25 = vector.load %arg8[%c0_11, %c0_12] : memref<4x32xf32, #tpu.memory_space<vmem>>, vector<4x32xf32>
    %cst_13 = arith.constant dense<0.000000e+00> : vector<4x256xf32>
    %26 = tpu.matmul %25, %24, %cst_13 {dimension_numbers = #tpu.dot_dimension_numbers<[1], [0], [0], [1], [0, 0, 1, 1], [], []>} : vector<4x32xf32>, vector<32x256xf32>, vector<4x256xf32> -> vector<4x256xf32>
    %c0_14 = arith.constant 0 : index
    %c0_15 = arith.constant 0 : index
    %27 = vector.load %arg9[%c0_14, %c0_15] : memref<4x1xf32, #tpu.memory_space<vmem>>, vector<4x1xf32>
    %28 = vector.broadcast %27 : vector<4x1xf32> to vector<4x256xf32>
    %29 = arith.addf %26, %28 : vector<4x256xf32>
    %30 = arith.subf %29, %7 : vector<4x256xf32>
    %31 = arith.mulf %30, %30 : vector<4x256xf32>
    %c0_16 = arith.constant 0 : index
    %c0_17 = arith.constant 0 : index
    %c0_18 = arith.constant 0 : index
    %32 = vector.load %arg10[%c0_16, %c0_17, %c0_18] : memref<1x4x256xf32, #tpu.memory_space<vmem>>, vector<1x4x256xf32>
    %33 = vector.shape_cast %32 : vector<1x4x256xf32> to vector<4x256xf32>
    %34 = vector.shape_cast %31 : vector<4x256xf32> to vector<1x4x256xf32>
    tpu.vector_store %arg10[%c0_16, %c0_17, %c0_18], %34 {strides = array<i32>} : memref<1x4x256xf32, #tpu.memory_space<vmem>>, vector<1x4x256xf32>,
    return
  }
  func.func @transform_0(%arg0: i32, %arg1: i32) -> i32 {
    %c0_i32 = arith.constant 0 : i32
    %c0_i32_0 = arith.constant 0 : i32
    return %c0_i32 : i32
  }
  func.func @transform_1(%arg0: i32, %arg1: i32) -> i32 {
    %c0_i32 = arith.constant 0 : i32
    %c0_i32_0 = arith.constant 0 : i32
    return %c0_i32 : i32
  }
  func.func @transform_2(%arg0: i32, %arg1: i32) -> (i32, i32, i32) {
    %c0_i32 = arith.constant 0 : i32
    %c0_i32_0 = arith.constant 0 : i32
    return %arg0, %c0_i32, %arg1 : i32, i32, i32
  }
  func.func @transform_3(%arg0: i32, %arg1: i32) -> (i32, i32, i32) {
    %c0_i32 = arith.constant 0 : i32
    %c0_i32_0 = arith.constant 0 : i32
    return %arg0, %c0_i32, %arg1 : i32, i32, i32
  }
  func.func @transform_4(%arg0: i32, %arg1: i32) -> (i32, i32, i32) {
    %c0_i32 = arith.constant 0 : i32
    %c0_i32_0 = arith.constant 0 : i32
    %c0_i32_1 = arith.constant 0 : i32
    return %arg0, %c0_i32, %c0_i32_0 : i32, i32, i32
  }
  func.func @transform_5(%arg0: i32, %arg1: i32) -> (i32, i32) {
    %c0_i32 = arith.constant 0 : i32
    %c0_i32_0 = arith.constant 0 : i32
    %c0_i32_1 = arith.constant 0 : i32
    return %c0_i32, %c0_i32_0 : i32, i32
  }
  func.func @transform_6(%arg0: i32, %arg1: i32) -> (i32, i32) {
    %c0_i32 = arith.constant 0 : i32
    %c0_i32_0 = arith.constant 0 : i32
    %c0_i32_1 = arith.constant 0 : i32
    return %c0_i32, %c0_i32_0 : i32, i32
  }
  func.func @transform_7(%arg0: i32, %arg1: i32) -> (i32, i32) {
    %c0_i32 = arith.constant 0 : i32
    %c0_i32_0 = arith.constant 0 : i32
    %c0_i32_1 = arith.constant 0 : i32
    return %c0_i32, %c0_i32_0 : i32, i32
  }
  func.func @transform_8(%arg0: i32, %arg1: i32) -> (i32, i32, i32) {
    %c0_i32 = arith.constant 0 : i32
    %c0_i32_0 = arith.constant 0 : i32
    return %arg0, %c0_i32, %arg1 : i32, i32, i32
  }
}

</mosaic_0001>

<bundles_post_ra>
// kernel: tpu_custom_call.1
= control target key start
LH: loop header
LB: loop body
LE: loop exit
PB: predicated region body
PF: predicated region fallthrough
CT: control target
= control target key end

     0   :  { %s1370_s0 = inlined_call_operand.vmem [shape: f32[2], index: 0, kind: input, shape index: {}]   ;;  %s1371_s1 = inlined_call_operand.vmem [shape: f32[2], index: 1, kind: input, shape index: {}]   ;;  %s1372_s2 = inlined_call_operand.vmem [shape: f32[2,4,256], index: 2, kind: input, shape index: {}]   ;;  %s1373_s3 = inlined_call_operand.vmem [shape: f32[2,4,256], index: 3, kind: input, shape index: {}]   ;;  %s1374_s4 = inlined_call_operand.vmem [shape: f32[2,32,1], index: 4, kind: input, shape index: {}]   ;;  %s1375_s5 = inlined_call_operand.vmem [shape: f32[32,4], index: 5, kind: input, shape index: {}]   ;;  %s1376_s6 = inlined_call_operand.vmem [shape: f32[4,32], index: 6, kind: input, shape index: {}]   ;;  %s1377_s7 = inlined_call_operand.vmem [shape: f32[4,1], index: 7, kind: input, shape index: {}]   ;;  %s1378_s8 = inlined_call_operand.hbm [shape: f32[2,4,256], index: 8, kind: output, shape index: {}]  }
   0x1   :  { %1383 = sst [smem:[#allocation11_spill]] %s1370_s0 }
   0x2   :  { %1384 = sst [smem:[#allocation12_spill]] %s1371_s1 }
   0x3   :  { %13 = vsyncpa [#allocation4], 0 }
   0x4   :  { %14 = vsyncpa [#allocation6], 0 }
   0x5   :  { %15 = vsyncpa [#allocation3], 0 }
   0x6   :  { %17 = vsyncpa [#allocation3 + $0x1], 0  ;;  %s1188_s27 = smov 0   ;;  %s1190_s28 = smov 0  }
   0x7   :  { %s1192_s29 = smov 0   ;;  %s1194_s30 = smov 0  }
   0x8   :  { %s1196_s9 = smov 0   ;;  %s1198_s10 = smov 0  }
   0x9 LB: > { %s859_s11 = sadd.s32 4294967295, %s1136_s10   ;;  %s860_s12 = sadd.s32 4294967294, %s1136_s10   ;;  %s1136_s10 = sphi %s1198_s10, %s23_s10   ;;  %s1132_s9 = sphi %s1196_s9, %s1400_s9   ;;  %s1128_s30 = sphi %s1194_s30, %s1399_s30   ;;  %s1124_s29 = sphi %s1192_s29, %s1398_s29   ;;  %s1120_s28 = sphi %s1190_s28, %s1397_s28   ;;  %s1116_s27 = sphi %s1188_s27, %s1396_s27  }
   0xa   : > { %s35_s13 = sadd.s32 1, %s1132_s9  ;;  %s231_s14 = sadd.s32 1, %s1124_s29 }
   0xb   : > { %p37_p0 = scmp.ge.s32.totalorder %s35_s13, 2  ;;  %p241_p1 = scmp.ne.s32.totalorder %s1124_s29, %s1120_s28 }
   0xc   : > { %p242_p2 = scmp.eq.s32.totalorder %s859_s11, 1  ;;  %p247_p3 = scmp.ne.s32.totalorder %s1120_s28, %s1116_s27 }
   0xd   : > { %s1402_s13 = smov (%p37_p0, %s35_s13), 0  ;;  %p248_p5 = scmp.eq.s32.totalorder %s860_s12, 1 }
   0xe   : > { %p1228_p4 = por %p242_p2, %p241_p1  ;;  %s226_s16 = ssub.s32 %s1132_s9, %s1402_s13 }
   0xf   : > { %p861_p6 = scmp.ge.s32.totalorder %s1136_s10, 1  ;;  %p229_p7 = scmp.eq.s32.totalorder %s226_s16, 0 }
  0x10   : > { %s1385_s15 = scalar_select %p1228_p4, 1, 0 }
  0x11   : > { %p1235_p8 = por %p248_p5, %p247_p3  ;;  %p255_p9 = scmp.lt.s32.totalorder %s1136_s10, 3 }
  0x12   : > { %s1241_s18 = scalar_select %p229_p7, %s1124_s29, %s231_s14  }
  0x13   : > { %s1386_s17 = scalar_select %p1235_p8, 1, 0 }
  0x14   : > { %p1243_p10 = pnand %p861_p6, %p255_p9  ;;  %p1247_p11 = scmp.eq.s32.totalorder %s859_s11, 0 }
  0x15   : > { %s1389_s0 = sld [smem:[#allocation11_spill]]  ;;  %s1390_s1 = sld [smem:[#allocation12_spill]] }
  0x16   : > { %s1387_s19 = scalar_select %p1243_p10, 1, 0 }
  0x17   : > { %s1388_s20 = scalar_select %p1247_p11, 1, 0 }
  0x18   : > { %p917_p12 = pneg %p1243_p10 }
  0x1a   : > { %p1261_p13 = pnand %p1247_p11, %p917_p12 }
  0x1b   : > { %s268_s23 = sshll.u32 %s1389_s0, 4  ;;  %s279_s26 = sshll.u32 %s1390_s1, 4  ;;  %s269_s23 = int_to_ptr.vmem [resolvable:$true] %s268_s23  ;;  %s280_s26 = int_to_ptr.vmem [resolvable:$true] %s279_s26 }
  0x1c   : > { %s1020_s11 = scalar_lea.vmem %s269_s23, 16  ;;  %p1022_p1 = pneg %p1261_p13 }
  0x1d   : > { %p1021_p0 = scmp.ne.s32.totalorder %s269_s23, %s1020_s11  ;;  %p1028_p5 = scmp.lt.s32.totalorder %s269_s23, %s269_s23 }
  0x1e   : > { %p1029_p6 = scmp.lt.s32.totalorder %s1020_s11, %s1020_s11 }
  0x1f   : > { %p1023_p2 = pnand %p1022_p1, %p1021_p0 }
  0x20   : > { %p1030_p7 = por %p1029_p6, %p1028_p5 }
  0x21   : > { %p1024_p3 = pneg %p1023_p2 }
  0x23   : > { %p1031_p9 = pnand %p1030_p7, %p1024_p3 }
  0x25   : > { %1034 = shalt.err (!%p1031_p9)
}
  0x26   : > { %s1138_s14 = smov [#allocation2]   ;;  %s1035_s16 = scalar_lea.vmem %s280_s26, 16 }
  0x27   : > { %920 = dma.vmem_to_smem (!%p1261_p13), %s269_s23, 16, %s1138_s14, [#allocation4]  }
  0x28   : > { %p1036_p12 = scmp.ne.s32.totalorder %s280_s26, %s1035_s16  ;;  %p1043_p11 = scmp.lt.s32.totalorder %s280_s26, %s280_s26 }
  0x29   : > { %p1044_p10 = scmp.lt.s32.totalorder %s1035_s16, %s1035_s16 }
  0x2a   : > { %p1038_p8 = pnand %p1036_p12, %p1022_p1 }
  0x2b   : > { %p1045_p0 = por %p1044_p10, %p1043_p11 }
  0x2c   : > { %p1039_p4 = pneg %p1038_p8 }
  0x2e   : > { %p1046_p2 = pnand %p1045_p0, %p1039_p4 }
  0x30   : > { %1049 = shalt.err (!%p1046_p2)
}
  0x31   : > { %s1139_s21 = smov [#allocation5]   ;;  %p1392_p3 = scmp.ne.s32.totalorder %s1387_s19, 0 }
  0x32   : > { %923 = dma.vmem_to_smem (!%p1261_p13), %s280_s26, 16, %s1139_s21, [#allocation6]  }
  0x33   : > { %335 = sbr.rel (%p1392_p3) target bundleno = 576 (0x240), region = 52  ;;  %p1393_p5 = scmp.ne.s32.totalorder (!%p1392_p3), %s1388_s20, 0 }
  0x3a   : > { %1103 = dma.done.wait (%p1393_p5), [#allocation4], 16  }
  0x3b   : > { %1105 = vsyncadd (%p1393_p5), [#allocation4], 4294967280 }
  0x3c   : > { %1107 = dma.done.wait (%p1393_p5), [#allocation6], 16  }
  0x3d   : > { %1109 = vsyncadd (%p1393_p5), [#allocation6], 4294967280 }
  0x3e   : > { %345 = sfence }
  0x3f   : > { %p393_p4 = scmp.lt.s32.totalorder %s1128_s30, 1  ;;  %s418_s19 = sld [smem:[#allocation2 + %s1128_s30]]  ;;  %v1140_v0 = vmov 0.0   ;;  %v1141_v1 = vmov 0   ;;  %vm470_vm0 = vcmask 1043456   ;;  %v427_v14 = vld [vmem:[%s1375_s5] sm:$0xff] }
  0x40   : > { %s419_s22 = sld [smem:[#allocation5 + %s1128_s30]]  ;;  %539 = vmatprep.mubr.f32.mxu0 %v1140_v0  ;;  %695 = vmatprep.mubr.f32.mxu1 %v1140_v0  ;;  %vm457_vm1 = vcmask 31744   ;;  %v621_v15 = vld [vmem:[%s1377_s7] sm:$0xf]  ;;  %v428_v16 = vld [vmem:[%s1375_s5 + $0x8] sm:$0xff]  ;;  %v429_v17 = vld [vmem:[%s1375_s5 + $0x10] sm:$0xff] }
  0x41   : > { %s394_s23 = scalar_select %p393_p4, %s1128_s30, 1  ;;  %985 = vset.pattern.permute.xlu0 %v1141_v1  ;;  %986 = vset.pattern.permute.xlu1 %v1141_v1  ;;  %v430_v18 = vld [vmem:[%s1375_s5 + $0x18] sm:$0xff]  ;;  %vm627_vm2 = vcmask 261120  }
  0x42   : > { %p1394_p10 = scmp.ne.s32.totalorder %s1385_s15, 0 }
  0x43   : > { %s895_s24 = sshll.u32 %s394_s23, 3  ;;  %s897_s25 = sshll.u32 %s394_s23, 5 }
  0x44   : > { %s400_s12 = scalar_lea.vmem %s1372_s2, %s895_s24  ;;  %s410_s16 = scalar_lea.vmem %s1373_s3, %s895_s24 }
  0x45   : > { %v420_v2 = vld [vmem:[%s400_s12] sm:$0xff]  ;;  %v422_v4 = vstv %s418_s19  ;;  %s416_s1 = scalar_lea.vmem %s1374_s4, %s897_s25  ;;  %s898_s19 = sshll.u32 %s1128_s30, 7 }
  0x46   : > { %v1291_v3 = vld [vmem:[%s410_s16] sm:$0xff]  ;;  %v423_v5 = vmul.f32 %v422_v4, %v420_v2  ;;  %v424_v6 = vstv %s419_s22  ;;  %v433_v8 = vld [vmem:[%s416_s1 + $0x10] sm:$0xff]  ;;  %v432_v10 = vld [vmem:[%s416_s1 + $0x8] sm:$0xff]  ;;  %s389_s16 = sand.u32 1, %s1120_s28   ;;  %s1323_s24 = scalar_lea.hbm %s1378_s8, %s898_s19 }
  0x47   : > { %v431_v7 = vld [vmem:[%s416_s1] sm:$0xff]  ;;  %v425_v9 = vmul.f32 %v424_v6, %v1291_v3  ;;  %447 = vperm.xlu1 %986, %v433_v8   ;;  %v434_v11 = vld [vmem:[%s416_s1 + $0x18] sm:$0xff]  ;;  %s868_s21 = sshll.u32 %s389_s16, 3  ;;  %s715_s25 = scalar_lea.sflag [#allocation3], %s389_s16 }
  0x48   : > { %437 = vperm.xlu0 %985, %v431_v7   ;;  %s391_s23 = scalar_lea.vmem [#allocation7], %s868_s21  ;;  %s1142_s30 = smov [#allocation7]  }
  0x49   : > { %v426_v12 = vadd.f32 %v425_v9, %v423_v5  ;;  %s731_s0 = sshll.u32 %s391_s23, 4  ;;  %s1054_s20 = sshll.u32 %s1142_s30, 4  ;;  %s1325_s0 = int_to_ptr.vmem [resolvable:$true] %s731_s0  ;;  %s1055_s20 = int_to_ptr.vmem [resolvable:$false] %s1054_s20 }
  0x4a   : > { %s1050_s26 = scalar_lea.vmem %s1325_s0, 128  ;;  %s1056_s12 = scalar_lea.vmem %s1055_s20, 256 }
  0x4b   : > { %v456_v13 = vcombine.high %v426_v12, %v426_v12  ;;  %452 = vperm.xlu1 %986, %v434_v11   ;;  %p1051_p8 = scmp.ne.s32.totalorder %s1325_s0, %s1050_s26  ;;  %p1057_p1 = scmp.lt.s32.totalorder %s1325_s0, %s1055_s20 }
  0x4c   : > { %442 = vperm.xlu0 %985, %v432_v10   ;;  %p1058_p6 = scmp.lt.s32.totalorder %s1056_s12, %s1050_s26 }
  0x4d   : > { %875 = vmatprep.subr.msk.mxu0 %vm470_vm0, %v456_v13  ;;  %p1052_p11 = pnand %p1051_p8, %p1394_p10 }
  0x4e   : > { %876 = vmatpush1.msk.msra.mxu0 %vm470_vm0, %v426_v12  ;;  %p1059_p7 = por %p1058_p6, %p1057_p1 }
  0x4f   : > { %877 = vmatmul.mubr.msk.f32.vlgmr.msra.gmra.mrb[0].mxu0 %vm457_vm1, %v427_v14  ;;  %p1053_p13 = pneg %p1052_p11 }
  0x50   : > { %624 = vperm.xlu0 %985, %v621_v15   ;;  %545 = vmatprep.mubr.f32.mxu0 %v1140_v0 }
  0x51   : > { %p1060_p9 = pnand %p1059_p7, %p1053_p13 }
  0x53   : > { %878 = vmatmul.mubr.msk.f32.gmra.mrb[2].mxu0 %vm457_vm1, %v428_v16 }
  0x54   : > { %551 = vmatprep.mubr.f32.mxu0 %v1140_v0 }
  0x57   : > { %879 = vmatmul.mubr.msk.f32.gmra.mrb[4].mxu0 %vm457_vm1, %v429_v17 }
  0x58   : > { %557 = vmatprep.mubr.f32.mxu0 %v1140_v0 }
  0x5b   : > { %880 = vmatmul.mubr.msk.f32.gmra.mrb[6].mxu0 %vm457_vm1, %v430_v18 }
  0xc6   : > { %v448_v30 = vpop.permute.xlu1 %447 }
  0xc7   : > { %v438_v19 = vpop.permute.xlu0 %437 }
  0xca   : > { %v453_v39 = vpop.permute.xlu1 %452 }
  0xcb   : > { %v443_v25 = vpop.permute.xlu0 %442 }
 0x122   : > { %v541_v20 = vpop.f32.mrb[0].mxu0 }
 0x123   : > { %v542_v21 = vadd.f32 %v541_v20, %v438_v19  ;;  %v543_v22 = vpop.f32.mrb[1].mxu0  ;;  %v620_v20 = vld [vmem:[%s1376_s6] sm:$0xf] }
 0x124   : > { %v544_v23 = vadd.f32 %v543_v22, %v438_v19 }
 0x125   : > { %v881_v24 = vmul.f32 -1.442695, %v542_v21 }
 0x126   : > { %v882_v26 = vmul.f32 -1.442695, %v544_v23  ;;  %v547_v27 = vpop.f32.mrb[2].mxu0 }
 0x127   : > { %988 = vpow2.f32 %v881_v24  ;;  %v548_v28 = vadd.f32 %v547_v27, %v443_v25  ;;  %v549_v29 = vpop.f32.mrb[3].mxu0 }
 0x128   : > { %990 = vpow2.f32 %v882_v26  ;;  %v550_v31 = vadd.f32 %v549_v29, %v443_v25 }
 0x129   : > { %v883_v32 = vmul.f32 -1.442695, %v548_v28 }
 0x12a   : > { %v884_v33 = vmul.f32 -1.442695, %v550_v31  ;;  %v553_v34 = vpop.f32.mrb[4].mxu0 }
 0x12b   : > { %992 = vpow2.f32 %v883_v32  ;;  %v554_v35 = vadd.f32 %v553_v34, %v448_v30  ;;  %v555_v36 = vpop.f32.mrb[5].mxu0 }
 0x12c   : > { %994 = vpow2.f32 %v884_v33  ;;  %v556_v37 = vadd.f32 %v555_v36, %v448_v30 }
 0x12d   : > { %v885_v38 = vmul.f32 -1.442695, %v554_v35 }
 0x12e   : > { %v886_v40 = vmul.f32 -1.442695, %v556_v37  ;;  %v559_v41 = vpop.f32.mrb[6].mxu0 }
 0x12f   : > { %996 = vpow2.f32 %v885_v38  ;;  %v560_v42 = vadd.f32 %v559_v41, %v453_v39  ;;  %v561_v43 = vpop.f32.mrb[7].mxu0 }
 0x130   : > { %998 = vpow2.f32 %v886_v40  ;;  %v562_v44 = vadd.f32 %v561_v43, %v453_v39 }
 0x131   : > { %v989_v45 = vpop.eup %988  ;;  %v887_v46 = vmul.f32 -1.442695, %v560_v42 }
 0x132   : > { %v991_v47 = vpop.eup %990  ;;  %v588_v48 = vadd.f32 1.0, %v989_v45  ;;  %v888_v49 = vmul.f32 -1.442695, %v562_v44 }
 0x133   : > { %v589_v50 = vadd.f32 1.0, %v991_v47  ;;  %1000 = vpow2.f32 %v887_v46 }
 0x134   : > { %1002 = vrcp.f32 %v588_v48 }
 0x135   : > { %v993_v51 = vpop.eup %992  ;;  %1004 = vpow2.f32 %v888_v49 }
 0x136   : > { %v995_v52 = vpop.eup %994  ;;  %v590_v53 = vadd.f32 1.0, %v993_v51  ;;  %1006 = vrcp.f32 %v589_v50 }
 0x137   : > { %v591_v54 = vadd.f32 1.0, %v995_v52 }
 0x138   : > { %1008 = vrcp.f32 %v590_v53 }
 0x139   : > { %v997_v55 = vpop.eup %996  ;;  %1010 = vrcp.f32 %v591_v54 }
 0x13a   : > { %v999_v56 = vpop.eup %998  ;;  %v592_v57 = vadd.f32 1.0, %v997_v55 }
 0x13b   : > { %v593_v59 = vadd.f32 1.0, %v999_v56 }
 0x13c   : > { %1012 = vrcp.f32 %v592_v57 }
 0x13d   : > { %v1001_v58 = vpop.eup %1000 }
 0x13e   : > { %v594_v60 = vadd.f32 1.0, %v1001_v58  ;;  %v1003_v61 = vpop.eup %1002 }
 0x13f   : > { %v1005_v62 = vpop.eup %1004  ;;  %v612_v4 = vmul.f32 %v1003_v61, %v542_v21  ;;  %v625_v21 = vpop.permute.xlu0 %624 }
 0x140   : > { %1014 = vrcp.f32 %v594_v60  ;;  %v1007_v63 = vpop.eup %1006  ;;  %v595_v0 = vadd.f32 1.0, %v1005_v62 }
 0x141   : > { %1016 = vrcp.f32 %v593_v59  ;;  %v613_v6 = vmul.f32 %v1007_v63, %v544_v23  ;;  %v703_v23 = vcombine.high %v1291_v3, %v1291_v3 }
 0x142   : > { %v1009_v1 = vpop.eup %1008  ;;  %1018 = vrcp.f32 %v595_v0 }
 0x143   : > { %v1011_v2 = vpop.eup %1010  ;;  %v614_v5 = vmul.f32 %v1009_v1, %v548_v28 }
 0x144   : > { %v615_v7 = vmul.f32 %v1011_v2, %v550_v31 }
 0x145   : > { %v901_v8 = vpack.c.bf16 %v614_v5, %v612_v4 }
 0x146   : > { %v899_v9 = vpack.c.bf16 %v615_v7, %v613_v6  ;;  %v1013_v10 = vpop.eup %1012 }
 0x147   : > { %v616_v13 = vmul.f32 %v1013_v10, %v554_v35 }
 0x148   : > { %900 = vmatprep.subr.bf16.mxu1 %v899_v9 }
 0x149   : > { %902 = vmatpush1.bf16.msra.mxu1 %v901_v8 }
 0x14a   : > { %v1015_v11 = vpop.eup %1014 }
 0x14b   : > { %v1017_v12 = vpop.eup %1016  ;;  %v618_v14 = vmul.f32 %v1015_v11, %v560_v42 }
 0x14c   : > { %v1019_v15 = vpop.eup %1018  ;;  %v617_v17 = vmul.f32 %v1017_v12, %v556_v37 }
 0x14d   : > { %v905_v16 = vpack.c.bf16 %v618_v14, %v616_v13  ;;  %v619_v18 = vmul.f32 %v1019_v15, %v562_v44 }
 0x14f   : > { %v903_v19 = vpack.c.bf16 %v619_v18, %v617_v17 }
 0x151   : > { %904 = vmatprep.subr.bf16.mxu1 %v903_v19 }
 0x152   : > { %906 = vmatpush1.bf16.msra.mxu1 %v905_v16 }
 0x155   : > { %889 = vmatmul.mubr.msk.f32.vlgmr.msra.gmra.mrb[0].mxu1 %vm627_vm2, %v620_v20 }
 0x228   : > { %v697_v22 = vpop.f32.mrb[0].mxu1 }
 0x229   : > { %v698_v24 = vadd.f32 %v697_v22, %v625_v21  ;;  %v699_v25 = vpop.f32.mrb[1].mxu1 }
 0x22a   : > { %v700_v26 = vadd.f32 %v699_v25, %v625_v21 }
 0x22b   : > { %v705_v27 = vsub.f32 %v698_v24, %v1291_v3 }
 0x22c   : > { %v706_v28 = vsub.f32 %v700_v26, %v703_v23 }
 0x22d   : > { %v707_v29 = vmul.f32 %v705_v27, %v705_v27 }
 0x22e   : > { %v708_v30 = vmul.f32 %v706_v28, %v706_v28 }
 0x230   : > { %v711_v31 = vcombine.low %v707_v29, %v708_v30 }
 0x232   : > { %713 = vst [vmem:[%s391_s23] sm:$0xff] %v711_v31 }
 0x233   : > { %1063 = shalt.err (!%p1060_p9)
}
 0x234   : > { %s1064_s11 = scalar_lea.hbm %s1323_s24, 128  ;;  %s1068_s21 = scalar_lea.hbm %s1378_s8, 256 }
 0x235   : > { %p1065_p12 = scmp.ne.s32.totalorder %s1323_s24, %s1064_s11  ;;  %p1069_p3 = scmp.lt.u32.totalorder %s1323_s24, %s1378_s8 }
 0x236   : > { %p1070_p5 = scmp.lt.u32.totalorder %s1068_s21, %s1064_s11  ;;  %p1072_p8 = scmp.lt.u32.totalorder %s1064_s11, %s1323_s24 }
 0x237   : > { %p1066_p0 = pnand %p1065_p12, %p1394_p10 }
 0x238   : > { %p1071_p4 = por %p1070_p5, %p1069_p3 }
 0x239   : > { %p1067_p2 = pneg %p1066_p0 }
 0x23a   : > { %p1073_p11 = por %p1072_p8, %p1071_p4 }
 0x23c   : > { %p1074_p13 = pnand %p1073_p11, %p1067_p2 }
 0x23e   : > { %1077 = shalt.err (!%p1074_p13)
}
 0x23f   : > { %915 = dma.vmem_to_hbm [thread:$0]  (%p1394_p10), %s1325_s0, 128, %s1323_s24, %s715_s25  }
 0x240 PF: > { %p932_p1 = scmp.ge.s32.totalorder %s1136_s10, 2  ;;  %s743_s22 = sand.u32 1, %s1116_s27  }
 0x241   : > { %p1395_p6 = scmp.ne.s32.totalorder %s1386_s17, 0  ;;  %s744_s1 = scalar_lea.sflag [#allocation3], %s743_s22 }
 0x243   : > { %p925_p7 = pnand %p932_p1, %p1395_p6 }
 0x245   : > { %1111 = dma.done.wait (!%p925_p7), %s744_s1, 128  }
 0x246   : > { %1113 = vsyncadd (!%p925_p7), %s744_s1, 4294967168  ;;  %s23_s10 = sadd.s32 1, %s1136_s10   ;;  %s1396_s27 = smov %s1120_s28 }
 0x247   : > { %p20_p9 = scmp.ge.s32.totalorder %s23_s10, 4   ;;  %s1397_s28 = smov %s1124_s29 }
 0x248   : > { %s1398_s29 = smov %s1241_s18  ;;  %s1399_s30 = smov %s1132_s9 }
 0x249   : > { %s1400_s9 = smov %s1402_s13  ;;  %22 = sbr.rel (!%p20_p9) target bundleno = 9 (0x9), region = 102 }
 0x250   :  { %749 = vsyncpa [#allocation3], 1 }
 0x251   :  { %751 = vsyncpa [#allocation3 + $0x1], 1 }
 0x252   :  { %752 = vsyncpa [#allocation4], 1 }
 0x253   :  { %754 = vsyncpa [#allocation4 + $0x1], 1 }
 0x254   :  { %755 = vsyncpa [#allocation6], 1 }

</bundles_post_ra>
